<compile_context>
chip_gen: v7x
topology: tpu7x:2x2x1
jax: 0.10.0
libtpu: 0.0.40
codegen_flags: <defaults>
</compile_context>

<pallas_src>
import jax
import jax.numpy as jnp
from jax import lax
from jax.experimental import pallas as pl
from jax.experimental.pallas import tpu as pltpu

# ---------------- hyper-parameters (small, synthetic) ----------------
B = 2          # batch
L = 8          # sequence length
D_MODEL = 32   # model dim
NUM_HEADS = 4
D_K = D_MODEL // NUM_HEADS


# ---------------- fused MHA kernel: whole batch in one invocation ----------------
def _mha_fused_kernel(qkv_ref, wqkv_ref, bqkv_ref, wo_ref, bo_ref,
                      out_ref, attn_ref):
    # qkv_ref  : (B*L, 3D)  packed [q | k | v]; rows are (batch, pos) row-major
    # wqkv_ref : (3D, 3D)   block-diag(Wq, Wk, Wv)  (built once outside jit)
    # bqkv_ref : (1, 3D)    [bq | bk | bv]
    # wo_ref   : (D, D);  bo_ref : (1, D)
    # out_ref  : (B*L, D);  attn_ref : (B*H, L, L)

    # ---- merged Q/K/V projection: one MXU matmul for the whole batch -----
    y = (jnp.dot(qkv_ref[...], wqkv_ref[...],
                 preferred_element_type=jnp.float32)
         + bqkv_ref[...])                               # (B*L, 3D) = [Q | K | V]

    scale = 1.0 / (D_K ** 0.5)
    attn_blocks = []        # B*H blocks of (L, L)
    out_rows = []           # B blocks of (L, D)
    for b in range(B):                                  # fully unrolled (B*H = 8 tiles)
        yb = y[b * L:(b + 1) * L, :]                    # sublane-aligned (multiple of 8)
        o_heads = []
        for h in range(NUM_HEADS):
            qh = yb[:, 0 * D_MODEL + h * D_K: 0 * D_MODEL + (h + 1) * D_K]  # (L, d_k)
            kh = yb[:, 1 * D_MODEL + h * D_K: 1 * D_MODEL + (h + 1) * D_K]
            vh = yb[:, 2 * D_MODEL + h * D_K: 2 * D_MODEL + (h + 1) * D_K]
            # contract over d_k of both operands -> no explicit transpose
            s = lax.dot_general(qh, kh, (((1,), (1,)), ((), ())),
                                preferred_element_type=jnp.float32) * scale  # (L, L)
            s = s - jnp.max(s, axis=-1, keepdims=True)   # stable softmax
            e = jnp.exp(s)
            p = e / jnp.sum(e, axis=-1, keepdims=True)   # exact normalization
            attn_blocks.append(p)
            o_heads.append(jnp.dot(p, vh, preferred_element_type=jnp.float32))
        out_rows.append(jnp.concatenate(o_heads, axis=-1))      # (L, D)

    # ---- output projection on one (B*L, D) slab; one store per output -----
    o_flat = jnp.concatenate(out_rows, axis=0)                   # (B*L, D)
    out_ref[...] = (jnp.dot(o_flat, wo_ref[...],
                            preferred_element_type=jnp.float32) + bo_ref[...])
    attn_ref[...] = jnp.stack(attn_blocks, axis=0)               # (B*H, L, L)


def merge_params(params):
    """Build merged projection weights ONCE, outside the jitted call path."""
    d = params["wq"].shape[0]
    z = jnp.zeros((d, d), jnp.float32)
    # [q | k | v] (., 3D) @ blockdiag(Wq, Wk, Wv) (3D, 3D) = [Q | K | V]
    wqkv = jnp.block([[params["wq"], z, z],
                      [z, params["wk"], z],
                      [z, z, params["wv"]]])                     # (3D, 3D)
    bqkv = jnp.concatenate(
        [params["bq"], params["bk"], params["bv"]]).reshape(1, 3 * d)
    bo = params["bo"].reshape(1, d)
    return wqkv, bqkv, params["wo"], bo


def multi_head_attention(k, v, q, wqkv, bqkv, wo, bo):
    """Mirrors MultiHeadAttention.forward(k, v, q, mask=None) (eval mode)."""
    Bx, Lx, Dx = k.shape
    H = NUM_HEADS

    # Single packed activation input -> one DMA descriptor, no in-kernel concat.
    qkv2d = jnp.concatenate([q, k, v], axis=-1).reshape(Bx * Lx, 3 * Dx)

    vmem = pltpu.MemorySpace.VMEM
    out2d, attn3d = pl.pallas_call(
        _mha_fused_kernel,
        out_shape=(
            jax.ShapeDtypeStruct((Bx * Lx, Dx), jnp.float32),
            jax.ShapeDtypeStruct((Bx * H, Lx, Lx), jnp.float32),
        ),
        in_specs=[
            pl.BlockSpec(memory_space=vmem),   # packed qkv (B*L, 3D)
            pl.BlockSpec(memory_space=vmem),   # merged W_qkv (3D, 3D)
            pl.BlockSpec(memory_space=vmem),   # merged b_qkv (1, 3D)
            pl.BlockSpec(memory_space=vmem),   # W_out (D, D)
            pl.BlockSpec(memory_space=vmem),   # b_out (1, D)
        ],
        out_specs=(
            pl.BlockSpec(memory_space=vmem),
            pl.BlockSpec(memory_space=vmem),
        ),
    )(qkv2d, wqkv, bqkv, wo, bo)

    # Row-major-compatible reshapes (metadata only) back to the module layout.
    return out2d.reshape(Bx, Lx, Dx), attn3d.reshape(Bx, H, Lx, Lx)


# ---------------- pure-JAX reference (for correctness check) ----------------
def reference_mha(k, v, q, params):
    Bx, Lx, Dx = k.shape
    H, dk = NUM_HEADS, D_K
    HIGH = jax.lax.Precision.HIGHEST

    def proj(x, w, b):
        y = jnp.dot(x.reshape(-1, Dx), w, precision=HIGH) + b
        return y.reshape(Bx, Lx, H, dk).transpose(0, 2, 1, 3)

    kh = proj(k, params["wk"], params["bk"])
    vh = proj(v, params["wv"], params["bv"])
    qh = proj(q, params["wq"], params["bq"])
    s = jnp.einsum("bhqd,bhkd->bhqk", qh, kh, precision=HIGH) / (dk ** 0.5)
    p = jax.nn.softmax(s, axis=-1)
    o = jnp.einsum("bhqk,bhkd->bhqd", p, vh, precision=HIGH)
    o = o.transpose(0, 2, 1, 3).reshape(Bx, Lx, Dx)
    out = jnp.dot(o.reshape(-1, Dx), params["wo"], precision=HIGH) + params["bo"]
    return out.reshape(Bx, Lx, Dx), p


# ---------------- deterministic parameter init ----------------
def init_params(key):
    keys = jax.random.split(key, 8)
    bound = 1.0 / (D_MODEL ** 0.5)

    def u(kk, shape):
        return jax.random.uniform(kk, shape, jnp.float32, -bound, bound)

    # Weights stored as (Din, Dout) so the kernel does x @ W + b
    return {
        "wk": u(keys[0], (D_MODEL, D_MODEL)), "bk": u(keys[1], (D_MODEL,)),
        "wv": u(keys[2], (D_MODEL, D_MODEL)), "bv": u(keys[3], (D_MODEL,)),
        "wq": u(keys[4], (D_MODEL, D_MODEL)), "bq": u(keys[5], (D_MODEL,)),
        "wo": u(keys[6], (D_MODEL, D_MODEL)), "bo": u(keys[7], (D_MODEL,)),
    }


if __name__ == "__main__":
    root = jax.random.PRNGKey(0)
    kk, kv, kq, kp = jax.random.split(root, 4)

    k_in = jax.random.normal(kk, (B, L, D_MODEL), jnp.float32)
    v_in = jax.random.normal(kv, (B, L, D_MODEL), jnp.float32)
    q_in = jax.random.normal(kq, (B, L, D_MODEL), jnp.float32)
    params = init_params(kp)

    # Merged projection weights prepared once, outside the jitted call path.
    wqkv, bqkv, wo, bo = jax.block_until_ready(merge_params(params))

    mha = jax.jit(multi_head_attention)
    out, attn = mha(k_in, v_in, q_in, wqkv, bqkv, wo, bo)
    jax.block_until_ready((out, attn))

    assert out.shape == (B, L, D_MODEL)
    assert attn.shape == (B, NUM_HEADS, L, L)
    # exact softmax normalization -> rows sum to 1 tightly
    assert bool(jnp.allclose(jnp.sum(attn, axis=-1), 1.0, atol=1e-4))

    # compare against a pure-JAX reference
    ref_out, ref_attn = reference_mha(k_in, v_in, q_in, params)
    assert bool(jnp.allclose(out, ref_out, atol=1e-3, rtol=1e-3))
    assert bool(jnp.allclose(attn, ref_attn, atol=1e-3, rtol=1e-3))

    print("KERNEL_OK")
</pallas_src>

<mosaic_0001>
module attributes {stable_mosaic.version = 11 : i64} {
  func.func @_mha_fused_kernel(%arg0: memref<16x96xf32, #tpu.memory_space<vmem>>, %arg1: memref<96x96xf32, #tpu.memory_space<vmem>>, %arg2: memref<1x96xf32, #tpu.memory_space<vmem>>, %arg3: memref<32x32xf32, #tpu.memory_space<vmem>>, %arg4: memref<1x32xf32, #tpu.memory_space<vmem>>, %arg5: memref<16x32xf32, #tpu.memory_space<vmem>>, %arg6: memref<8x8x8xf32, #tpu.memory_space<vmem>>) attributes {dimension_semantics = [], scalar_prefetch = 0 : i64, scratch_operands = 0 : i64, tpu.core_type = #tpu.core_type<tc>} {
    %c0 = arith.constant 0 : index
    %c0_0 = arith.constant 0 : index
    %0 = vector.load %arg0[%c0, %c0_0] : memref<16x96xf32, #tpu.memory_space<vmem>>, vector<16x96xf32>
    %c0_1 = arith.constant 0 : index
    %c0_2 = arith.constant 0 : index
    %1 = vector.load %arg1[%c0_1, %c0_2] : memref<96x96xf32, #tpu.memory_space<vmem>>, vector<96x96xf32>
    %cst = arith.constant dense<0.000000e+00> : vector<16x96xf32>
    %2 = tpu.matmul %0, %1, %cst {dimension_numbers = #tpu.dot_dimension_numbers<[1], [0], [0], [1], [0, 0, 1, 1], [], []>} : vector<16x96xf32>, vector<96x96xf32>, vector<16x96xf32> -> vector<16x96xf32>
    %c0_3 = arith.constant 0 : index
    %c0_4 = arith.constant 0 : index
    %3 = vector.load %arg2[%c0_3, %c0_4] : memref<1x96xf32, #tpu.memory_space<vmem>>, vector<1x96xf32>
    %4 = vector.broadcast %3 : vector<1x96xf32> to vector<16x96xf32>
    %5 = arith.addf %2, %4 : vector<16x96xf32>
    %6 = vector.extract_strided_slice %5 {offsets = [0, 0], sizes = [8, 96], strides = [1, 1]} : vector<16x96xf32> to vector<8x96xf32>
    %7 = vector.extract_strided_slice %6 {offsets = [0, 0], sizes = [8, 8], strides = [1, 1]} : vector<8x96xf32> to vector<8x8xf32>
    %8 = vector.extract_strided_slice %6 {offsets = [0, 32], sizes = [8, 8], strides = [1, 1]} : vector<8x96xf32> to vector<8x8xf32>
    %9 = vector.extract_strided_slice %6 {offsets = [0, 64], sizes = [8, 8], strides = [1, 1]} : vector<8x96xf32> to vector<8x8xf32>
    %cst_5 = arith.constant dense<0.000000e+00> : vector<8x8xf32>
    %10 = tpu.matmul %7, %8, %cst_5 {dimension_numbers = #tpu.dot_dimension_numbers<[1], [1], [0], [0], [0, 0, 1, 0], [], []>} : vector<8x8xf32>, vector<8x8xf32>, vector<8x8xf32> -> vector<8x8xf32>
    %cst_6 = arith.constant 0.353553385 : f32
    %11 = vector.broadcast %cst_6 : f32 to vector<8x8xf32>
    %12 = arith.mulf %10, %11 : vector<8x8xf32>
    %cst_7 = arith.constant dense<0xFF800000> : vector<8xf32>
    %13 = vector.multi_reduction <maximumf>, %12, %cst_7 [1] : vector<8x8xf32> to vector<8xf32>
    %14 = vector.shape_cast %13 : vector<8xf32> to vector<8x1xf32>
    %15 = vector.broadcast %14 : vector<8x1xf32> to vector<8x8xf32>
    %16 = arith.subf %12, %15 : vector<8x8xf32>
    %17 = math.exp %16 : vector<8x8xf32>
    %cst_8 = arith.constant dense<0.000000e+00> : vector<8xf32>
    %18 = vector.multi_reduction <add>, %17, %cst_8 [1] : vector<8x8xf32> to vector<8xf32>
    %19 = vector.shape_cast %18 : vector<8xf32> to vector<8x1xf32>
    %20 = vector.broadcast %19 : vector<8x1xf32> to vector<8x8xf32>
    %21 = arith.divf %17, %20 : vector<8x8xf32>
    %cst_9 = arith.constant dense<0.000000e+00> : vector<8x8xf32>
    %22 = tpu.matmul %21, %9, %cst_9 {dimension_numbers = #tpu.dot_dimension_numbers<[1], [0], [0], [1], [0, 0, 1, 1], [], []>} : vector<8x8xf32>, vector<8x8xf32>, vector<8x8xf32> -> vector<8x8xf32>
    %23 = vector.extract_strided_slice %6 {offsets = [0, 8], sizes = [8, 8], strides = [1, 1]} : vector<8x96xf32> to vector<8x8xf32>
    %24 = vector.extract_strided_slice %6 {offsets = [0, 40], sizes = [8, 8], strides = [1, 1]} : vector<8x96xf32> to vector<8x8xf32>
    %25 = vector.extract_strided_slice %6 {offsets = [0, 72], sizes = [8, 8], strides = [1, 1]} : vector<8x96xf32> to vector<8x8xf32>
    %cst_10 = arith.constant dense<0.000000e+00> : vector<8x8xf32>
    %26 = tpu.matmul %23, %24, %cst_10 {dimension_numbers = #tpu.dot_dimension_numbers<[1], [1], [0], [0], [0, 0, 1, 0], [], []>} : vector<8x8xf32>, vector<8x8xf32>, vector<8x8xf32> -> vector<8x8xf32>
    %cst_11 = arith.constant 0.353553385 : f32
    %27 = vector.broadcast %cst_11 : f32 to vector<8x8xf32>
    %28 = arith.mulf %26, %27 : vector<8x8xf32>
    %cst_12 = arith.constant dense<0xFF800000> : vector<8xf32>
    %29 = vector.multi_reduction <maximumf>, %28, %cst_12 [1] : vector<8x8xf32> to vector<8xf32>
    %30 = vector.shape_cast %29 : vector<8xf32> to vector<8x1xf32>
    %31 = vector.broadcast %30 : vector<8x1xf32> to vector<8x8xf32>
    %32 = arith.subf %28, %31 : vector<8x8xf32>
    %33 = math.exp %32 : vector<8x8xf32>
    %cst_13 = arith.constant dense<0.000000e+00> : vector<8xf32>
    %34 = vector.multi_reduction <add>, %33, %cst_13 [1] : vector<8x8xf32> to vector<8xf32>
    %35 = vector.shape_cast %34 : vector<8xf32> to vector<8x1xf32>
    %36 = vector.broadcast %35 : vector<8x1xf32> to vector<8x8xf32>
    %37 = arith.divf %33, %36 : vector<8x8xf32>
    %cst_14 = arith.constant dense<0.000000e+00> : vector<8x8xf32>
    %38 = tpu.matmul %37, %25, %cst_14 {dimension_numbers = #tpu.dot_dimension_numbers<[1], [0], [0], [1], [0, 0, 1, 1], [], []>} : vector<8x8xf32>, vector<8x8xf32>, vector<8x8xf32> -> vector<8x8xf32>
    %39 = vector.extract_strided_slice %6 {offsets = [0, 16], sizes = [8, 8], strides = [1, 1]} : vector<8x96xf32> to vector<8x8xf32>
    %40 = vector.extract_strided_slice %6 {offsets = [0, 48], sizes = [8, 8], strides = [1, 1]} : vector<8x96xf32> to vector<8x8xf32>
    %41 = vector.extract_strided_slice %6 {offsets = [0, 80], sizes = [8, 8], strides = [1, 1]} : vector<8x96xf32> to vector<8x8xf32>
    %cst_15 = arith.constant dense<0.000000e+00> : vector<8x8xf32>
    %42 = tpu.matmul %39, %40, %cst_15 {dimension_numbers = #tpu.dot_dimension_numbers<[1], [1], [0], [0], [0, 0, 1, 0], [], []>} : vector<8x8xf32>, vector<8x8xf32>, vector<8x8xf32> -> vector<8x8xf32>
    %cst_16 = arith.constant 0.353553385 : f32
    %43 = vector.broadcast %cst_16 : f32 to vector<8x8xf32>
    %44 = arith.mulf %42, %43 : vector<8x8xf32>
    %cst_17 = arith.constant dense<0xFF800000> : vector<8xf32>
    %45 = vector.multi_reduction <maximumf>, %44, %cst_17 [1] : vector<8x8xf32> to vector<8xf32>
    %46 = vector.shape_cast %45 : vector<8xf32> to vector<8x1xf32>
    %47 = vector.broadcast %46 : vector<8x1xf32> to vector<8x8xf32>
    %48 = arith.subf %44, %47 : vector<8x8xf32>
    %49 = math.exp %48 : vector<8x8xf32>
    %cst_18 = arith.constant dense<0.000000e+00> : vector<8xf32>
    %50 = vector.multi_reduction <add>, %49, %cst_18 [1] : vector<8x8xf32> to vector<8xf32>
    %51 = vector.shape_cast %50 : vector<8xf32> to vector<8x1xf32>
    %52 = vector.broadcast %51 : vector<8x1xf32> to vector<8x8xf32>
    %53 = arith.divf %49, %52 : vector<8x8xf32>
    %cst_19 = arith.constant dense<0.000000e+00> : vector<8x8xf32>
    %54 = tpu.matmul %53, %41, %cst_19 {dimension_numbers = #tpu.dot_dimension_numbers<[1], [0], [0], [1], [0, 0, 1, 1], [], []>} : vector<8x8xf32>, vector<8x8xf32>, vector<8x8xf32> -> vector<8x8xf32>
    %55 = vector.extract_strided_slice %6 {offsets = [0, 24], sizes = [8, 8], strides = [1, 1]} : vector<8x96xf32> to vector<8x8xf32>
    %56 = vector.extract_strided_slice %6 {offsets = [0, 56], sizes = [8, 8], strides = [1, 1]} : vector<8x96xf32> to vector<8x8xf32>
    %57 = vector.extract_strided_slice %6 {offsets = [0, 88], sizes = [8, 8], strides = [1, 1]} : vector<8x96xf32> to vector<8x8xf32>
    %cst_20 = arith.constant dense<0.000000e+00> : vector<8x8xf32>
    %58 = tpu.matmul %55, %56, %cst_20 {dimension_numbers = #tpu.dot_dimension_numbers<[1], [1], [0], [0], [0, 0, 1, 0], [], []>} : vector<8x8xf32>, vector<8x8xf32>, vector<8x8xf32> -> vector<8x8xf32>
    %cst_21 = arith.constant 0.353553385 : f32
    %59 = vector.broadcast %cst_21 : f32 to vector<8x8xf32>
    %60 = arith.mulf %58, %59 : vector<8x8xf32>
    %cst_22 = arith.constant dense<0xFF800000> : vector<8xf32>
    %61 = vector.multi_reduction <maximumf>, %60, %cst_22 [1] : vector<8x8xf32> to vector<8xf32>
    %62 = vector.shape_cast %61 : vector<8xf32> to vector<8x1xf32>
    %63 = vector.broadcast %62 : vector<8x1xf32> to vector<8x8xf32>
    %64 = arith.subf %60, %63 : vector<8x8xf32>
    %65 = math.exp %64 : vector<8x8xf32>
    %cst_23 = arith.constant dense<0.000000e+00> : vector<8xf32>
    %66 = vector.multi_reduction <add>, %65, %cst_23 [1] : vector<8x8xf32> to vector<8xf32>
    %67 = vector.shape_cast %66 : vector<8xf32> to vector<8x1xf32>
    %68 = vector.broadcast %67 : vector<8x1xf32> to vector<8x8xf32>
    %69 = arith.divf %65, %68 : vector<8x8xf32>
    %cst_24 = arith.constant dense<0.000000e+00> : vector<8x8xf32>
    %70 = tpu.matmul %69, %57, %cst_24 {dimension_numbers = #tpu.dot_dimension_numbers<[1], [0], [0], [1], [0, 0, 1, 1], [], []>} : vector<8x8xf32>, vector<8x8xf32>, vector<8x8xf32> -> vector<8x8xf32>
    %71 = tpu.concatenate %22, %38, %54, %70 in 1 : vector<8x8xf32>, vector<8x8xf32>, vector<8x8xf32>, vector<8x8xf32> -> vector<8x32xf32>
    %72 = vector.extract_strided_slice %5 {offsets = [8, 0], sizes = [8, 96], strides = [1, 1]} : vector<16x96xf32> to vector<8x96xf32>
    %73 = vector.extract_strided_slice %72 {offsets = [0, 0], sizes = [8, 8], strides = [1, 1]} : vector<8x96xf32> to vector<8x8xf32>
    %74 = vector.extract_strided_slice %72 {offsets = [0, 32], sizes = [8, 8], strides = [1, 1]} : vector<8x96xf32> to vector<8x8xf32>
    %75 = vector.extract_strided_slice %72 {offsets = [0, 64], sizes = [8, 8], strides = [1, 1]} : vector<8x96xf32> to vector<8x8xf32>
    %cst_25 = arith.constant dense<0.000000e+00> : vector<8x8xf32>
    %76 = tpu.matmul %73, %74, %cst_25 {dimension_numbers = #tpu.dot_dimension_numbers<[1], [1], [0], [0], [0, 0, 1, 0], [], []>} : vector<8x8xf32>, vector<8x8xf32>, vector<8x8xf32> -> vector<8x8xf32>
    %cst_26 = arith.constant 0.353553385 : f32
    %77 = vector.broadcast %cst_26 : f32 to vector<8x8xf32>
    %78 = arith.mulf %76, %77 : vector<8x8xf32>
    %cst_27 = arith.constant dense<0xFF800000> : vector<8xf32>
    %79 = vector.multi_reduction <maximumf>, %78, %cst_27 [1] : vector<8x8xf32> to vector<8xf32>
    %80 = vector.shape_cast %79 : vector<8xf32> to vector<8x1xf32>
    %81 = vector.broadcast %80 : vector<8x1xf32> to vector<8x8xf32>
    %82 = arith.subf %78, %81 : vector<8x8xf32>
    %83 = math.exp %82 : vector<8x8xf32>
    %cst_28 = arith.constant dense<0.000000e+00> : vector<8xf32>
    %84 = vector.multi_reduction <add>, %83, %cst_28 [1] : vector<8x8xf32> to vector<8xf32>
    %85 = vector.shape_cast %84 : vector<8xf32> to vector<8x1xf32>
    %86 = vector.broadcast %85 : vector<8x1xf32> to vector<8x8xf32>
    %87 = arith.divf %83, %86 : vector<8x8xf32>
    %cst_29 = arith.constant dense<0.000000e+00> : vector<8x8xf32>
    %88 = tpu.matmul %87, %75, %cst_29 {dimension_numbers = #tpu.dot_dimension_numbers<[1], [0], [0], [1], [0, 0, 1, 1], [], []>} : vector<8x8xf32>, vector<8x8xf32>, vector<8x8xf32> -> vector<8x8xf32>
    %89 = vector.extract_strided_slice %72 {offsets = [0, 8], sizes = [8, 8], strides = [1, 1]} : vector<8x96xf32> to vector<8x8xf32>
    %90 = vector.extract_strided_slice %72 {offsets = [0, 40], sizes = [8, 8], strides = [1, 1]} : vector<8x96xf32> to vector<8x8xf32>
    %91 = vector.extract_strided_slice %72 {offsets = [0, 72], sizes = [8, 8], strides = [1, 1]} : vector<8x96xf32> to vector<8x8xf32>
    %cst_30 = arith.constant dense<0.000000e+00> : vector<8x8xf32>
    %92 = tpu.matmul %89, %90, %cst_30 {dimension_numbers = #tpu.dot_dimension_numbers<[1], [1], [0], [0], [0, 0, 1, 0], [], []>} : vector<8x8xf32>, vector<8x8xf32>, vector<8x8xf32> -> vector<8x8xf32>
    %cst_31 = arith.constant 0.353553385 : f32
    %93 = vector.broadcast %cst_31 : f32 to vector<8x8xf32>
    %94 = arith.mulf %92, %93 : vector<8x8xf32>
    %cst_32 = arith.constant dense<0xFF800000> : vector<8xf32>
    %95 = vector.multi_reduction <maximumf>, %94, %cst_32 [1] : vector<8x8xf32> to vector<8xf32>
    %96 = vector.shape_cast %95 : vector<8xf32> to vector<8x1xf32>
    %97 = vector.broadcast %96 : vector<8x1xf32> to vector<8x8xf32>
    %98 = arith.subf %94, %97 : vector<8x8xf32>
    %99 = math.exp %98 : vector<8x8xf32>
    %cst_33 = arith.constant dense<0.000000e+00> : vector<8xf32>
    %100 = vector.multi_reduction <add>, %99, %cst_33 [1] : vector<8x8xf32> to vector<8xf32>
    %101 = vector.shape_cast %100 : vector<8xf32> to vector<8x1xf32>
    %102 = vector.broadcast %101 : vector<8x1xf32> to vector<8x8xf32>
    %103 = arith.divf %99, %102 : vector<8x8xf32>
    %cst_34 = arith.constant dense<0.000000e+00> : vector<8x8xf32>
    %104 = tpu.matmul %103, %91, %cst_34 {dimension_numbers = #tpu.dot_dimension_numbers<[1], [0], [0], [1], [0, 0, 1, 1], [], []>} : vector<8x8xf32>, vector<8x8xf32>, vector<8x8xf32> -> vector<8x8xf32>
    %105 = vector.extract_strided_slice %72 {offsets = [0, 16], sizes = [8, 8], strides = [1, 1]} : vector<8x96xf32> to vector<8x8xf32>
    %106 = vector.extract_strided_slice %72 {offsets = [0, 48], sizes = [8, 8], strides = [1, 1]} : vector<8x96xf32> to vector<8x8xf32>
    %107 = vector.extract_strided_slice %72 {offsets = [0, 80], sizes = [8, 8], strides = [1, 1]} : vector<8x96xf32> to vector<8x8xf32>
    %cst_35 = arith.constant dense<0.000000e+00> : vector<8x8xf32>
    %108 = tpu.matmul %105, %106, %cst_35 {dimension_numbers = #tpu.dot_dimension_numbers<[1], [1], [0], [0], [0, 0, 1, 0], [], []>} : vector<8x8xf32>, vector<8x8xf32>, vector<8x8xf32> -> vector<8x8xf32>
    %cst_36 = arith.constant 0.353553385 : f32
    %109 = vector.broadcast %cst_36 : f32 to vector<8x8xf32>
    %110 = arith.mulf %108, %109 : vector<8x8xf32>
    %cst_37 = arith.constant dense<0xFF800000> : vector<8xf32>
    %111 = vector.multi_reduction <maximumf>, %110, %cst_37 [1] : vector<8x8xf32> to vector<8xf32>
    %112 = vector.shape_cast %111 : vector<8xf32> to vector<8x1xf32>
    %113 = vector.broadcast %112 : vector<8x1xf32> to vector<8x8xf32>
    %114 = arith.subf %110, %113 : vector<8x8xf32>
    %115 = math.exp %114 : vector<8x8xf32>
    %cst_38 = arith.constant dense<0.000000e+00> : vector<8xf32>
    %116 = vector.multi_reduction <add>, %115, %cst_38 [1] : vector<8x8xf32> to vector<8xf32>
    %117 = vector.shape_cast %116 : vector<8xf32> to vector<8x1xf32>
    %118 = vector.broadcast %117 : vector<8x1xf32> to vector<8x8xf32>
    %119 = arith.divf %115, %118 : vector<8x8xf32>
    %cst_39 = arith.constant dense<0.000000e+00> : vector<8x8xf32>
    %120 = tpu.matmul %119, %107, %cst_39 {dimension_numbers = #tpu.dot_dimension_numbers<[1], [0], [0], [1], [0, 0, 1, 1], [], []>} : vector<8x8xf32>, vector<8x8xf32>, vector<8x8xf32> -> vector<8x8xf32>
    %121 = vector.extract_strided_slice %72 {offsets = [0, 24], sizes = [8, 8], strides = [1, 1]} : vector<8x96xf32> to vector<8x8xf32>
    %122 = vector.extract_strided_slice %72 {offsets = [0, 56], sizes = [8, 8], strides = [1, 1]} : vector<8x96xf32> to vector<8x8xf32>
    %123 = vector.extract_strided_slice %72 {offsets = [0, 88], sizes = [8, 8], strides = [1, 1]} : vector<8x96xf32> to vector<8x8xf32>
    %cst_40 = arith.constant dense<0.000000e+00> : vector<8x8xf32>
    %124 = tpu.matmul %121, %122, %cst_40 {dimension_numbers = #tpu.dot_dimension_numbers<[1], [1], [0], [0], [0, 0, 1, 0], [], []>} : vector<8x8xf32>, vector<8x8xf32>, vector<8x8xf32> -> vector<8x8xf32>
    %cst_41 = arith.constant 0.353553385 : f32
    %125 = vector.broadcast %cst_41 : f32 to vector<8x8xf32>
    %126 = arith.mulf %124, %125 : vector<8x8xf32>
    %cst_42 = arith.constant dense<0xFF800000> : vector<8xf32>
    %127 = vector.multi_reduction <maximumf>, %126, %cst_42 [1] : vector<8x8xf32> to vector<8xf32>
    %128 = vector.shape_cast %127 : vector<8xf32> to vector<8x1xf32>
    %129 = vector.broadcast %128 : vector<8x1xf32> to vector<8x8xf32>
    %130 = arith.subf %126, %129 : vector<8x8xf32>
    %131 = math.exp %130 : vector<8x8xf32>
    %cst_43 = arith.constant dense<0.000000e+00> : vector<8xf32>
    %132 = vector.multi_reduction <add>, %131, %cst_43 [1] : vector<8x8xf32> to vector<8xf32>
    %133 = vector.shape_cast %132 : vector<8xf32> to vector<8x1xf32>
    %134 = vector.broadcast %133 : vector<8x1xf32> to vector<8x8xf32>
    %135 = arith.divf %131, %134 : vector<8x8xf32>
    %cst_44 = arith.constant dense<0.000000e+00> : vector<8x8xf32>
    %136 = tpu.matmul %135, %123, %cst_44 {dimension_numbers = #tpu.dot_dimension_numbers<[1], [0], [0], [1], [0, 0, 1, 1], [], []>} : vector<8x8xf32>, vector<8x8xf32>, vector<8x8xf32> -> vector<8x8xf32>
    %137 = tpu.concatenate %88, %104, %120, %136 in 1 : vector<8x8xf32>, vector<8x8xf32>, vector<8x8xf32>, vector<8x8xf32> -> vector<8x32xf32>
    %138 = tpu.concatenate %71, %137 in 0 : vector<8x32xf32>, vector<8x32xf32> -> vector<16x32xf32>
    %c0_45 = arith.constant 0 : index
    %c0_46 = arith.constant 0 : index
    %139 = vector.load %arg3[%c0_45, %c0_46] : memref<32x32xf32, #tpu.memory_space<vmem>>, vector<32x32xf32>
    %cst_47 = arith.constant dense<0.000000e+00> : vector<16x32xf32>
    %140 = tpu.matmul %138, %139, %cst_47 {dimension_numbers = #tpu.dot_dimension_numbers<[1], [0], [0], [1], [0, 0, 1, 1], [], []>} : vector<16x32xf32>, vector<32x32xf32>, vector<16x32xf32> -> vector<16x32xf32>
    %c0_48 = arith.constant 0 : index
    %c0_49 = arith.constant 0 : index
    %141 = vector.load %arg4[%c0_48, %c0_49] : memref<1x32xf32, #tpu.memory_space<vmem>>, vector<1x32xf32>
    %142 = vector.broadcast %141 : vector<1x32xf32> to vector<16x32xf32>
    %143 = arith.addf %140, %142 : vector<16x32xf32>
    %c0_50 = arith.constant 0 : index
    %c0_51 = arith.constant 0 : index
    %144 = vector.load %arg5[%c0_50, %c0_51] : memref<16x32xf32, #tpu.memory_space<vmem>>, vector<16x32xf32>
    tpu.vector_store %arg5[%c0_50, %c0_51], %143 {strides = array<i32>} : memref<16x32xf32, #tpu.memory_space<vmem>>, vector<16x32xf32>,
    %145 = vector.shape_cast %21 : vector<8x8xf32> to vector<1x8x8xf32>
    %146 = vector.shape_cast %37 : vector<8x8xf32> to vector<1x8x8xf32>
    %147 = vector.shape_cast %53 : vector<8x8xf32> to vector<1x8x8xf32>
    %148 = vector.shape_cast %69 : vector<8x8xf32> to vector<1x8x8xf32>
    %149 = vector.shape_cast %87 : vector<8x8xf32> to vector<1x8x8xf32>
    %150 = vector.shape_cast %103 : vector<8x8xf32> to vector<1x8x8xf32>
    %151 = vector.shape_cast %119 : vector<8x8xf32> to vector<1x8x8xf32>
    %152 = vector.shape_cast %135 : vector<8x8xf32> to vector<1x8x8xf32>
    %153 = tpu.concatenate %145, %146, %147, %148, %149, %150, %151, %152 in 0 : vector<1x8x8xf32>, vector<1x8x8xf32>, vector<1x8x8xf32>, vector<1x8x8xf32>, vector<1x8x8xf32>, vector<1x8x8xf32>, vector<1x8x8xf32>, vector<1x8x8xf32> -> vector<8x8x8xf32>
    %c0_52 = arith.constant 0 : index
    %c0_53 = arith.constant 0 : index
    %c0_54 = arith.constant 0 : index
    %154 = vector.load %arg6[%c0_52, %c0_53, %c0_54] : memref<8x8x8xf32, #tpu.memory_space<vmem>>, vector<8x8x8xf32>
    tpu.vector_store %arg6[%c0_52, %c0_53, %c0_54], %153 {strides = array<i32>} : memref<8x8x8xf32, #tpu.memory_space<vmem>>, vector<8x8x8xf32>,
    return
  }
}

</mosaic_0001>

<bundles_post_ra>
// kernel: multi_head_attention.1
= control target key start
LH: loop header
LB: loop body
LE: loop exit
PB: predicated region body
PF: predicated region fallthrough
CT: control target
= control target key end

     0   :  { %12 = vsyncpa [#allocation3], 0  ;;  %s2274_s0 = inlined_call_operand.vmem [shape: f32[16,96], index: 0, kind: input, shape index: {}]   ;;  %s2275_s1 = inlined_call_operand.hbm [shape: f32[96,96], index: 1, kind: input, shape index: {}]   ;;  %s2276_s2 = inlined_call_operand.vmem [shape: f32[1,96], index: 2, kind: input, shape index: {}]   ;;  %s2277_s3 = inlined_call_operand.vmem [shape: f32[32,32], index: 3, kind: input, shape index: {}]   ;;  %s2278_s4 = inlined_call_operand.vmem [shape: f32[1,32], index: 4, kind: input, shape index: {}]   ;;  %s2279_s5 = inlined_call_operand.hbm [shape: f32[16,32], index: 5, kind: output, shape index: {0}]   ;;  %s2280_s6 = inlined_call_operand.hbm [shape: f32[8,8,8], index: 6, kind: output, shape index: {1}]  }
   0x1   :  { %13 = vsyncpa [#allocation4], 0 }
   0x2   :  { %14 = vsyncpa [#allocation7], 0  ;;  %s1992_s21 = smov [#allocation2]   ;;  %s1920_s25 = scalar_lea.hbm %s2275_s1, 1536 }
   0x3   :  { %s22_s22 = sshll.u32 %s1992_s21, 4  ;;  %p1921_p0 = scmp.ne.s32.totalorder %s2275_s1, %s1920_s25  ;;  %s23_s22 = int_to_ptr.vmem [resolvable:$true] %s22_s22 }
   0x4   :  { %p1924_p1 = scmp.lt.u32.totalorder %s1920_s25, %s2275_s1 }
   0x6   :  { %p1926_p2 = pnand %p1924_p1, %p1921_p0 }
   0x8   :  { %1929 = shalt.err (!%p1926_p2)
}
   0x9   :  { %s1930_s30 = scalar_lea.vmem %s23_s22, 1536  ;;  %p1935_p4 = scmp.lt.s32.totalorder %s23_s22, %s23_s22 }
   0xa   :  { %p1931_p3 = scmp.ne.s32.totalorder %s23_s22, %s1930_s30  ;;  %p1936_p5 = scmp.lt.s32.totalorder %s1930_s30, %s1930_s30 }
   0xc   :  { %p1937_p6 = por %p1936_p5, %p1935_p4 }
   0xe   :  { %p1938_p7 = pnand %p1937_p6, %p1931_p3 }
  0x10   :  { %1941 = shalt.err (!%p1938_p7)
}
  0x11   :  { %s1993_s7 = smov 128   ;;  %s1994_s8 = smov 8  }
  0x12   :  { %28 = dma.hbm_to_vmem [thread:$0]  %s2275_s1, 1536, %s23_s22, [#allocation3], %s1993_s7, %s1993_s7, %s1994_s8  }
  0x13   :  { %1986 = dma.done.wait [#allocation3], 1536  }
  0x14   :  { %1987 = vsyncadd [#allocation3], 4294965760  ;;  %v40_v0 = vld [vmem:[#allocation2] sm:$0xff]  ;;  %v41_v1 = vld [vmem:[#allocation2 + $0x8] sm:$0xff]  ;;  %vm59_vm0 = vcmask 785408   ;;  %v1995_v20 = vmov 0.0  }
  0x15   :  { %v42_v2 = vld [vmem:[#allocation2 + $0x10] sm:$0xff]  ;;  %v1836_v3 = vpack.c.bf16 %v41_v1, %v40_v0  ;;  %v43_v4 = vld [vmem:[#allocation2 + $0x18] sm:$0xff]  ;;  %v44_v6 = vld [vmem:[#allocation2 + $0x20] sm:$0xff]  ;;  %1745 = vmatprep.subr.mxu1 %v1995_v20  ;;  %vm1996_vm1 = vmmov 0   ;;  %s1998_s16 = smov 96   ;;  %s1999_s17 = smov 88  }
  0x16   :  { %v1840_v5 = vpack.c.bf16 %v43_v4, %v42_v2  ;;  %v45_v7 = vld [vmem:[#allocation2 + $0x28] sm:$0xff]  ;;  %v38_v8 = vld [vmem:[%s2274_s0] sm:$0xff]  ;;  %v46_v10 = vld [vmem:[#allocation2 + $0x30] sm:$0xff]  ;;  %1747 = vmatprep.mubr.msk.f32.mxu1 %vm1996_vm1, %v1995_v20  ;;  %vm144_vm2 = vcmask 64512   ;;  %s2001_s18 = smov 80   ;;  %s2002_s19 = smov 120  }
  0x17   :  { %1837 = vmatprep.subr.bf16.mxu0 %v1836_v3  ;;  %v1844_v9 = vpack.c.bf16 %v45_v7, %v44_v6  ;;  %1742 = vmatprep.mubr.msk.f32.mxu0 %vm59_vm0, %v38_v8  ;;  %v47_v11 = vld [vmem:[#allocation2 + $0x38] sm:$0xff]  ;;  %v48_v13 = vld [vmem:[#allocation2 + $0x40] sm:$0xff]  ;;  %v49_v14 = vld [vmem:[#allocation2 + $0x48] sm:$0xff]  ;;  %s2003_s20 = smov 112   ;;  %s2004_s21 = smov 48   ;;  %vm818_vm3 = vcmask 130048  }
  0x18   :  { %1839 = vmatpush3.bf16.msra.mxu0 %v1836_v3  ;;  %v1848_v12 = vpack.c.bf16 %v47_v11, %v46_v10  ;;  %v1852_v15 = vpack.c.bf16 %v49_v14, %v48_v13  ;;  %v50_v16 = vld [vmem:[#allocation2 + $0x50] sm:$0xff]  ;;  %v51_v17 = vld [vmem:[#allocation2 + $0x58] sm:$0xff]  ;;  %v39_v19 = vld [vmem:[%s2274_s0 + $0x8] sm:$0xff]  ;;  %s1997_s0 = smov 64   ;;  %s2005_s22 = smov 72   ;;  %vm820_vm4 = vcmask 195584  }
  0x19   :  { %1841 = vmatprep.subr.bf16.mxu0 %v1840_v5  ;;  %v1856_v18 = vpack.c.bf16 %v51_v17, %v50_v16  ;;  %v1636_v21 = vld [vmem:[%s2276_s2] ss:$0 sm:$0xff]  ;;  %s2000_s2 = smov 56   ;;  %s2006_s23 = smov 104   ;;  %vm1511_vm5 = vcmask 261120  }
  0x1a   :  { %s2007_s24 = smov 40   ;;  %s2008_s25 = smov 16  }
  0x1b   :  { %s2009_s12 = smov 24  }
  0x1c   :  { %1843 = vmatpush3.bf16.msra.mxu0 %v1840_v5 }
  0x1d   :  { %1845 = vmatprep.subr.bf16.mxu0 %v1844_v9 }
  0x20   :  { %1847 = vmatpush3.bf16.msra.mxu0 %v1844_v9 }
  0x21   :  { %1849 = vmatprep.subr.bf16.mxu0 %v1848_v12 }
  0x24   :  { %1851 = vmatpush3.bf16.msra.mxu0 %v1848_v12 }
  0x25   :  { %1853 = vmatprep.subr.bf16.mxu0 %v1852_v15 }
  0x28   :  { %1855 = vmatpush3.bf16.msra.mxu0 %v1852_v15 }
  0x29   :  { %1857 = vmatprep.subr.bf16.mxu0 %v1856_v18 }
  0x2c   :  { %1859 = vmatpush3.bf16.msra.mxu0 %v1856_v18 }
  0x2d   :  { %1785 = vmatprep.subr.mxu0 %v1995_v20 }
  0x2f   :  { %1743 = vmatmul.mubr.msk.f32.vlgmr.msra.gmra.mrb[0].mxu0 %vm59_vm0, %v39_v19 }
  0x30   :  { %1787 = vmatprep.mubr.msk.f32.mxu0 %vm1996_vm1, %v1995_v20 }
 0x102   :  { %v1744_v22 = vpop.f32.mrb[0].mxu0 }
 0x103   :  { %v2079_v23 = vadd.f32 %v1744_v22, %v1636_v21  ;;  %v132_v24 = vpop.f32.mrb[1].mxu0 }
 0x104   :  { %v2081_v25 = vadd.f32 %v1636_v21, %v132_v24 }
 0x106   :  { %231 = vrot.lane.b32.xlu1 %v2081_v25, %s1997_s0  ;;  %142 = vrot.lane.b32.xlu0 %v2081_v25, %s1998_s16 }
 0x10a   :  { %309 = vrot.lane.b32.xlu1 %v2081_v25, %s1999_s17 }
 0x178   :  { %v143_v26 = vpop.permute.xlu0 %142  ;;  %v232_v27 = vpop.permute.xlu1 %231 }
 0x179   :  { %1746 = vmatpush3.xpose.msk.msra.mxu1 %vm144_vm2, %v143_v26 }
 0x17a   :  { %1750 = vmatprep.subr.mxu1 %v1995_v20 }
 0x17c   :  { %1748 = vmatmul.mubr.msk.f32.vlgmr.msra.gmra.mrb[0].mxu1 %vm144_vm2, %v2081_v25  ;;  %v310_v37 = vpop.permute.xlu1 %309 }
 0x17d   :  { %1751 = vmatpush3.msra.mxu1 %v232_v27  ;;  %1752 = vmatprep.mubr.msk.f32.mxu1 %vm1996_vm1, %v1995_v20 }
 0x17e   :  { %1755 = vmatprep.subr.mxu1 %v1995_v20 }
 0x24f   :  { %v215_v28 = vpop.f32.mrb[0].mxu1 }
 0x250   :  { %v219_v29 = vmul.f32 0.35355338, %v215_v28  ;;  %v1749_v30 = vpop.f32.mrb[1].mxu1 }
 0x252   :  { %v220_v31 = vsel %vm144_vm2, %v219_v29, -inf }
 0x253   :  { %221 = vmax.xlane.f32.xlu0 %v220_v31 }
 0x269   :  { %397 = vrot.lane.b32.xlu0 %v2081_v25, %s2000_s2 }
 0x26d   :  { %475 = vrot.lane.b32.xlu0 %v2081_v25, %s2001_s18 }
 0x2e0   :  { %v222_v32 = vpop.xlane.xlu0 %221 }
 0x2e1   :  { %v223_v33 = vsub.f32 %v219_v29, %v222_v32 }
 0x2e3   :  { %v224_v34 = vmul.f32 1.442695, %v223_v33 }
 0x2e4   :  { %v398_v42 = vpop.permute.xlu0 %397 }
 0x2e5   :  { %1888 = vpow2.f32 %v224_v34 }
 0x2e8   :  { %v476_v54 = vpop.permute.xlu0 %475 }
 0x2ef   :  { %v1889_v35 = vpop.eup %1888 }
 0x2f0   :  { %v226_v36 = vsel %vm144_vm2, %v1889_v35, 0.0 }
 0x2f1   :  { %227 = vadd.xlane.f32.xlu1 %v226_v36 }
 0x302   :  { %307 = vrot.lane.b32.xlu1 %v2081_v25, %s2002_s19 }
 0x37e   :  { %v228_v38 = vpop.xlane.xlu1 %227 }
 0x37f   :  { %1890 = vrcp.f32 %v228_v38 }
 0x382   :  { %v308_v41 = vpop.permute.xlu1 %307 }
 0x389   :  { %v1891_v39 = vpop.eup %1890 }
 0x38a   :  { %v230_v40 = vmul.f32 %v1891_v39, %v1889_v35 }
 0x38c   :  { %1595 = vst.msk [vmem:[#allocation6] sm:$0xff] %vm144_vm2, %v230_v40  ;;  %1753 = vmatmul.mubr.msk.f32.vlgmr.msra.gmra.mrb[2].mxu1 %vm144_vm2, %v230_v40 }
 0x38d   :  { %1756 = vmatpush3.xpose.msk.msra.mxu1 %vm144_vm2, %v310_v37  ;;  %1757 = vmatprep.mubr.msk.f32.mxu1 %vm1996_vm1, %v1995_v20 }
 0x38e   :  { %1760 = vmatprep.subr.mxu1 %v1995_v20 }
 0x390   :  { %1758 = vmatmul.mubr.msk.f32.vlgmr.msra.gmra.mrb[4].mxu1 %vm144_vm2, %v308_v41 }
 0x391   :  { %1761 = vmatpush3.msra.mxu1 %v398_v42  ;;  %1762 = vmatprep.mubr.msk.f32.mxu1 %vm1996_vm1, %v1995_v20 }
 0x392   :  { %1765 = vmatprep.subr.mxu1 %v1995_v20 }
 0x45f   :  { %v2114_v43 = vpop.f32.mrb[2].mxu1 }
 0x460   :  { %v1754_v44 = vpop.f32.mrb[3].mxu1 }
 0x463   :  { %v381_v45 = vpop.f32.mrb[4].mxu1 }
 0x464   :  { %v385_v46 = vmul.f32 0.35355338, %v381_v45  ;;  %v1759_v47 = vpop.f32.mrb[5].mxu1 }
 0x466   :  { %v386_v48 = vsel %vm144_vm2, %v385_v46, -inf }
 0x467   :  { %387 = vmax.xlane.f32.xlu1 %v386_v48 }
 0x4f4   :  { %v388_v49 = vpop.xlane.xlu1 %387 }
 0x4f5   :  { %v389_v50 = vsub.f32 %v385_v46, %v388_v49 }
 0x4f7   :  { %v390_v51 = vmul.f32 1.442695, %v389_v50 }
 0x4f9   :  { %1892 = vpow2.f32 %v390_v51 }
 0x503   :  { %v1893_v52 = vpop.eup %1892 }
 0x504   :  { %v392_v53 = vsel %vm144_vm2, %v1893_v52, 0.0 }
 0x505   :  { %393 = vadd.xlane.f32.xlu0 %v392_v53 }
 0x51b   :  { %473 = vrot.lane.b32.xlu0 %v2081_v25, %s2003_s20 }
 0x592   :  { %v394_v55 = vpop.xlane.xlu0 %393 }
 0x593   :  { %1894 = vrcp.f32 %v394_v55 }
 0x596   :  { %v474_v58 = vpop.permute.xlu0 %473 }
 0x59d   :  { %v1895_v56 = vpop.eup %1894 }
 0x59e   :  { %v396_v57 = vmul.f32 %v1895_v56, %v1893_v52 }
 0x5a0   :  { %1596 = vst.msk [vmem:[#allocation6 + $0x8] sm:$0xff] %vm144_vm2, %v396_v57  ;;  %1763 = vmatmul.mubr.msk.f32.vlgmr.msra.gmra.mrb[6].mxu1 %vm144_vm2, %v396_v57 }
 0x5a1   :  { %1766 = vmatpush3.xpose.msk.msra.mxu1 %vm144_vm2, %v476_v54  ;;  %1767 = vmatprep.mubr.msk.f32.mxu1 %vm1996_vm1, %v1995_v20 }
 0x5a2   :  { %1770 = vmatprep.subr.mxu1 %v1995_v20 }
 0x5a4   :  { %1768 = vmatmul.mubr.msk.f32.vlgmr.msra.gmra.mrb[8].mxu1 %vm144_vm2, %v474_v58 }
 0x5a5   :  { %1772 = vmatprep.mubr.msk.f32.mxu1 %vm1996_vm1, %v1995_v20 }
 0x673   :  { %v2129_v59 = vpop.f32.mrb[6].mxu1 }
 0x674   :  { %v1764_v60 = vpop.f32.mrb[7].mxu1 }
 0x677   :  { %v547_v61 = vpop.f32.mrb[8].mxu1 }
 0x678   :  { %v551_v62 = vmul.f32 0.35355338, %v547_v61  ;;  %v1769_v63 = vpop.f32.mrb[9].mxu1 }
 0x67a   :  { %v552_v0 = vsel %vm144_vm2, %v551_v62, -inf }
 0x67b   :  { %553 = vmax.xlane.f32.xlu1 %v552_v0 }
 0x68c   :  { %563 = vrot.lane.b32.xlu1 %v2081_v25, %s2004_s21 }
 0x690   :  { %641 = vrot.lane.b32.xlu1 %v2081_v25, %s2005_s22 }
 0x694   :  { %639 = vrot.lane.b32.xlu1 %v2081_v25, %s2006_s23 }
 0x698   :  { %823 = vrot.lane.b32.xlu1 %v2079_v23, %s1998_s16 }
 0x69c   :  { %989 = vrot.lane.b32.xlu1 %v2079_v23, %s1999_s17 }
 0x6a0   :  { %1155 = vrot.lane.b32.xlu1 %v2079_v23, %s2001_s18 }
 0x6a4   :  { %1153 = vrot.lane.b32.xlu1 %v2079_v23, %s2003_s20 }
 0x6a8   :  { %1321 = vrot.lane.b32.xlu1 %v2079_v23, %s2005_s22 }
 0x6ac   :  { %1319 = vrot.lane.b32.xlu1 %v2079_v23, %s2006_s23 }
 0x708   :  { %v554_v1 = vpop.xlane.xlu1 %553 }
 0x709   :  { %v555_v2 = vsub.f32 %v551_v62, %v554_v1 }
 0x70b   :  { %v556_v3 = vmul.f32 1.442695, %v555_v2 }
 0x70c   :  { %v564_v4 = vpop.permute.xlu1 %563 }
 0x70d   :  { %1896 = vpow2.f32 %v556_v3  ;;  %1771 = vmatpush3.msra.mxu1 %v564_v4 }
 0x70e   :  { %1775 = vmatprep.subr.mxu1 %v1995_v20 }
 0x710   :  { %v642_v5 = vpop.permute.xlu1 %641 }
 0x714   :  { %v640_v6 = vpop.permute.xlu1 %639 }
 0x717   :  { %v1897_v7 = vpop.eup %1896 }
 0x718   :  { %v824_v8 = vpop.permute.xlu1 %823  ;;  %v558_v9 = vsel %vm144_vm2, %v1897_v7, 0.0 }
 0x719   :  { %559 = vadd.xlane.f32.xlu0 %v558_v9  ;;  %1786 = vmatpush3.xpose.msk.msra.mxu0 %vm144_vm2, %v824_v8 }
 0x71a   :  { %1795 = vmatprep.subr.mxu0 %v1995_v20 }
 0x71c   :  { %1788 = vmatmul.mubr.msk.f32.vlgmr.msra.gmra.mrb[2].mxu0 %vm144_vm2, %v2079_v23  ;;  %v990_v10 = vpop.permute.xlu1 %989 }
 0x71d   :  { %1796 = vmatpush3.xpose.msk.msra.mxu0 %vm144_vm2, %v990_v10  ;;  %1797 = vmatprep.mubr.msk.f32.mxu0 %vm1996_vm1, %v1995_v20 }
 0x71e   :  { %1805 = vmatprep.subr.mxu0 %v1995_v20 }
 0x720   :  { %v1156_v11 = vpop.permute.xlu1 %1155 }
 0x724   :  { %v1154_v12 = vpop.permute.xlu1 %1153 }
 0x728   :  { %v1322_v15 = vpop.permute.xlu1 %1321 }
 0x72c   :  { %v1320_v17 = vpop.permute.xlu1 %1319 }
 0x72f   :  { %987 = vrot.lane.b32.xlu0 %v2079_v23, %s2002_s19 }
 0x7a6   :  { %v560_v13 = vpop.xlane.xlu0 %559 }
 0x7a7   :  { %1898 = vrcp.f32 %v560_v13 }
 0x7aa   :  { %v988_v14 = vpop.permute.xlu0 %987 }
 0x7ab   :  { %1798 = vmatmul.mubr.msk.f32.vlgmr.msra.gmra.mrb[4].mxu0 %vm144_vm2, %v988_v14 }
 0x7ac   :  { %1806 = vmatpush3.xpose.msk.msra.mxu0 %vm144_vm2, %v1156_v11  ;;  %1807 = vmatprep.mubr.msk.f32.mxu0 %vm1996_vm1, %v1995_v20 }
 0x7ad   :  { %1815 = vmatprep.subr.mxu0 %v1995_v20 }
 0x7af   :  { %1808 = vmatmul.mubr.msk.f32.vlgmr.msra.gmra.mrb[6].mxu0 %vm144_vm2, %v1154_v12 }
 0x7b0   :  { %1816 = vmatpush3.xpose.msk.msra.mxu0 %vm144_vm2, %v1322_v15  ;;  %1817 = vmatprep.mubr.msk.f32.mxu0 %vm1996_vm1, %v1995_v20 }
 0x7b1   :  { %v1899_v16 = vpop.eup %1898 }
 0x7b2   :  { %v562_v18 = vmul.f32 %v1899_v16, %v1897_v7 }
 0x7b3   :  { %1818 = vmatmul.mubr.msk.f32.vlgmr.msra.gmra.mrb[8].mxu0 %vm144_vm2, %v1320_v17 }
 0x7b4   :  { %1597 = vst.msk [vmem:[#allocation6 + $0x10] sm:$0xff] %vm144_vm2, %v562_v18  ;;  %1773 = vmatmul.mubr.msk.f32.vlgmr.msra.gmra.mrb[10].mxu1 %vm144_vm2, %v562_v18 }
 0x7b5   :  { %1776 = vmatpush3.xpose.msk.msra.mxu1 %vm144_vm2, %v642_v5  ;;  %1777 = vmatprep.mubr.msk.f32.mxu1 %vm1996_vm1, %v1995_v20 }
 0x7b6   :  { %1780 = vmatprep.subr.mxu1 %v1995_v20 }
 0x7b8   :  { %1778 = vmatmul.mubr.msk.f32.vlgmr.msra.gmra.mrb[12].mxu1 %vm144_vm2, %v640_v6 }
 0x7b9   :  { %1782 = vmatprep.mubr.msk.f32.mxu1 %vm1996_vm1, %v1995_v20 }
 0x7ef   :  { %v895_v19 = vpop.f32.mrb[2].mxu0 }
 0x7f0   :  { %v899_v21 = vmul.f32 0.35355338, %v895_v19  ;;  %v1789_v22 = vpop.f32.mrb[3].mxu0 }
 0x7f2   :  { %v900_v24 = vsel %vm144_vm2, %v899_v21, -inf }
 0x7f3   :  { %901 = vmax.xlane.f32.xlu0 %v900_v24 }
 0x87e   :  { %v1061_v26 = vpop.f32.mrb[4].mxu0 }
 0x87f   :  { %v1065_v27 = vmul.f32 0.35355338, %v1061_v26  ;;  %v1799_v28 = vpop.f32.mrb[5].mxu0 }
 0x880   :  { %v902_v29 = vpop.xlane.xlu0 %901  ;;  %v1501_v28 = vld [vmem:[%s2277_s3 + $0x8] sm:$0xff] }
 0x881   :  { %v903_v30 = vsub.f32 %v899_v21, %v902_v29  ;;  %v1066_v31 = vsel %vm144_vm2, %v1065_v27, -inf }
 0x882   :  { %1067 = vmax.xlane.f32.xlu0 %v1066_v31  ;;  %v1227_v32 = vpop.f32.mrb[6].mxu0 }
 0x883   :  { %v904_v33 = vmul.f32 1.442695, %v903_v30  ;;  %v1809_v34 = vpop.f32.mrb[7].mxu0  ;;  %v1231_v45 = vmul.f32 0.35355338, %v1227_v32  ;;  %v1502_v30 = vld [vmem:[%s2277_s3 + $0x10] sm:$0xff] }
 0x885   :  { %1900 = vpow2.f32 %v904_v33  ;;  %v1232_v49 = vsel %vm144_vm2, %v1231_v45, -inf }
 0x886   :  { %v1393_v35 = vpop.f32.mrb[8].mxu0 }
 0x887   :  { %v1397_v36 = vmul.f32 0.35355338, %v1393_v35  ;;  %v635_v37 = vpop.f32.mrb[10].mxu1  ;;  %v1819_v38 = vpop.f32.mrb[9].mxu0 }
 0x888   :  { %v1774_v39 = vpop.f32.mrb[11].mxu1 }
 0x889   :  { %v1398_v40 = vsel %vm144_vm2, %v1397_v36, -inf }
 0x88a   :  { %1399 = vmax.xlane.f32.xlu0 %v1398_v40 }
 0x88b   :  { %v713_v41 = vpop.f32.mrb[12].mxu1 }
 0x88c   :  { %v717_v42 = vmul.f32 0.35355338, %v713_v41  ;;  %v1779_v44 = vpop.f32.mrb[13].mxu1 }
 0x88e   :  { %v718_v46 = vsel %vm144_vm2, %v717_v42, -inf }
 0x88f   :  { %v1901_v47 = vpop.eup %1900  ;;  %719 = vmax.xlane.f32.xlu1 %v718_v46 }
 0x890   :  { %v906_v48 = vsel %vm144_vm2, %v1901_v47, 0.0 }
 0x891   :  { %907 = vadd.xlane.f32.xlu0 %v906_v48 }
 0x893   :  { %1233 = vmax.xlane.f32.xlu1 %v1232_v49 }
 0x90f   :  { %v1068_v50 = vpop.xlane.xlu0 %1067 }
 0x910   :  { %v1069_v51 = vsub.f32 %v1065_v27, %v1068_v50  ;;  %v1500_v27 = vld [vmem:[%s2277_s3] sm:$0xff] }
 0x911   :  { %v1860_v29 = vpack.c.bf16 %v1501_v28, %v1500_v27 }
 0x912   :  { %v1070_v52 = vmul.f32 1.442695, %v1069_v51 }
 0x913   :  { %1861 = vmatprep.subr.bf16.mxu0 %v1860_v29 }
 0x914   :  { %1902 = vpow2.f32 %v1070_v52  ;;  %1863 = vmatpush3.bf16.msra.mxu0 %v1860_v29 }
 0x917   :  { %v1400_v53 = vpop.xlane.xlu0 %1399 }
 0x918   :  { %v1401_v54 = vsub.f32 %v1397_v36, %v1400_v53 }
 0x91a   :  { %v1402_v55 = vmul.f32 1.442695, %v1401_v54 }
 0x91c   :  { %1904 = vpow2.f32 %v1402_v55  ;;  %v720_v56 = vpop.xlane.xlu1 %719 }
 0x91d   :  { %v721_v6 = vsub.f32 %v717_v42, %v720_v56 }
 0x91e   :  { %v1903_v57 = vpop.eup %1902  ;;  %v908_v58 = vpop.xlane.xlu0 %907 }
 0x91f   :  { %1906 = vrcp.f32 %v908_v58  ;;  %v1072_v60 = vsel %vm144_vm2, %v1903_v57, 0.0  ;;  %v722_v7 = vmul.f32 1.442695, %v721_v6 }
 0x920   :  { %1073 = vadd.xlane.f32.xlu1 %v1072_v60  ;;  %v1234_v61 = vpop.xlane.xlu1 %1233 }
 0x921   :  { %v1235_v62 = vsub.f32 %v1231_v45, %v1234_v61 }
 0x923   :  { %v1236_v63 = vmul.f32 1.442695, %v1235_v62 }
 0x925   :  { %1908 = vpow2.f32 %v1236_v63 }
 0x926   :  { %v1905_v0 = vpop.eup %1904  ;;  %1910 = vpow2.f32 %v722_v7 }
 0x927   :  { %v1404_v1 = vsel %vm144_vm2, %v1905_v0, 0.0 }
 0x928   :  { %1405 = vadd.xlane.f32.xlu1 %v1404_v1 }
 0x929   :  { %v1907_v2 = vpop.eup %1906 }
 0x92a   :  { %v910_v3 = vmul.f32 %v1907_v2, %v1901_v47 }
 0x92c   :  { %1599 = vst.msk [vmem:[#allocation6 + $0x20] sm:$0xff] %vm144_vm2, %v910_v3 }
 0x92f   :  { %v1909_v4 = vpop.eup %1908 }
 0x930   :  { %v1238_v5 = vsel %vm144_vm2, %v1909_v4, 0.0  ;;  %v1911_v8 = vpop.eup %1910 }
 0x931   :  { %1239 = vadd.xlane.f32.xlu0 %v1238_v5  ;;  %v724_v9 = vsel %vm144_vm2, %v1911_v8, 0.0 }
 0x939   :  { %911 = vrot.lane.b32.xlu1 %v2079_v23, %s1997_s0 }
 0x947   :  { %729 = vrot.lane.b32.xlu0 %v2081_v25, %s2007_s24 }
 0x94b   :  { %1243 = vrot.lane.b32.xlu0 %v2079_v23, %s2004_s21 }
 0x94f   :  { %806 = vrot.lane.b32.xlu0 %v2129_v59, %s1994_s8 }
 0x95d   :  { %725 = vadd.xlane.f32.xlu1 %v724_v9 }
 0x96e   :  { %1077 = vrot.lane.b32.xlu1 %v2079_v23, %s2000_s2 }
 0x972   :  { %1409 = vrot.lane.b32.xlu1 %v2079_v23, %s2007_s24 }
 0x976   :  { %810 = vrot.lane.b32.xlu1 %v635_v37, %s2008_s25 }
 0x9ad   :  { %v1074_v25 = vpop.xlane.xlu1 %1073 }
 0x9ae   :  { %1912 = vrcp.f32 %v1074_v25 }
 0x9b5   :  { %v1406_v10 = vpop.xlane.xlu1 %1405 }
 0x9b6   :  { %1914 = vrcp.f32 %v1406_v10 }
 0x9b8   :  { %v1913_v11 = vpop.eup %1912 }
 0x9b9   :  { %v1076_v12 = vmul.f32 %v1913_v11, %v1903_v57  ;;  %v912_v17 = vpop.permute.xlu1 %911 }
 0x9bb   :  { %1600 = vst.msk [vmem:[#allocation6 + $0x28] sm:$0xff] %vm144_vm2, %v1076_v12 }
 0x9be   :  { %v1240_v59 = vpop.xlane.xlu0 %1239 }
 0x9bf   :  { %1916 = vrcp.f32 %v1240_v59 }
 0x9c0   :  { %v1915_v13 = vpop.eup %1914 }
 0x9c1   :  { %v1408_v14 = vmul.f32 %v1915_v13, %v1905_v0 }
 0x9c2   :  { %v730_v15 = vpop.permute.xlu0 %729 }
 0x9c3   :  { %1602 = vst.msk [vmem:[#allocation6 + $0x38] sm:$0xff] %vm144_vm2, %v1408_v14  ;;  %1781 = vmatpush3.msra.mxu1 %v730_v15 }
 0x9c4   :  { %1790 = vmatprep.subr.mxu1 %v1995_v20 }
 0x9c6   :  { %v1244_v24 = vpop.permute.xlu0 %1243 }
 0x9c9   :  { %v1917_v23 = vpop.eup %1916 }
 0x9ca   :  { %v1242_v16 = vmul.f32 %v1917_v23, %v1909_v4  ;;  %v807_v42 = vpop.permute.xlu0 %806 }
 0x9cb   :  { %v817_v45 = vsel %vm144_vm2, %v2114_v43, %v807_v42 }
 0x9cc   :  { %1601 = vst.msk [vmem:[#allocation6 + $0x30] sm:$0xff] %vm144_vm2, %v1242_v16 }
 0x9ea   :  { %v726_v18 = vpop.xlane.xlu1 %725 }
 0x9eb   :  { %1918 = vrcp.f32 %v726_v18 }
 0x9ee   :  { %v1078_v22 = vpop.permute.xlu1 %1077 }
 0x9f2   :  { %v1410_v26 = vpop.permute.xlu1 %1409 }
 0x9f5   :  { %v1919_v19 = vpop.eup %1918 }
 0x9f6   :  { %v728_v21 = vmul.f32 %v1919_v19, %v1911_v8  ;;  %v811_v44 = vpop.permute.xlu1 %810 }
 0x9f7   :  { %v819_v46 = vsel %vm818_vm3, %v817_v45, %v811_v44 }
 0x9f8   :  { %1598 = vst.msk [vmem:[#allocation6 + $0x18] sm:$0xff] %vm144_vm2, %v728_v21  ;;  %1783 = vmatmul.mubr.msk.f32.vlgmr.msra.gmra.mrb[14].mxu1 %vm144_vm2, %v728_v21 }
 0x9f9   :  { %1791 = vmatpush3.msra.mxu1 %v912_v17  ;;  %1792 = vmatprep.mubr.msk.f32.mxu1 %vm1996_vm1, %v1995_v20 }
 0x9fa   :  { %1800 = vmatprep.subr.mxu1 %v1995_v20 }
 0x9fc   :  { %1793 = vmatmul.mubr.msk.f32.vlgmr.msra.gmra.mrb[16].mxu1 %vm144_vm2, %v910_v3 }
 0x9fd   :  { %1801 = vmatpush3.msra.mxu1 %v1078_v22  ;;  %1802 = vmatprep.mubr.msk.f32.mxu1 %vm1996_vm1, %v1995_v20 }
 0x9fe   :  { %1810 = vmatprep.subr.mxu1 %v1995_v20 }
 0xa00   :  { %1803 = vmatmul.mubr.msk.f32.vlgmr.msra.gmra.mrb[18].mxu1 %vm144_vm2, %v1076_v12 }
 0xa01   :  { %1811 = vmatpush3.msra.mxu1 %v1244_v24  ;;  %1812 = vmatprep.mubr.msk.f32.mxu1 %vm1996_vm1, %v1995_v20 }
 0xa02   :  { %1820 = vmatprep.subr.mxu1 %v1995_v20 }
 0xa04   :  { %1813 = vmatmul.mubr.msk.f32.vlgmr.msra.gmra.mrb[20].mxu1 %vm144_vm2, %v1242_v16 }
 0xa05   :  { %1821 = vmatpush3.msra.mxu1 %v1410_v26  ;;  %1822 = vmatprep.mubr.msk.f32.mxu1 %vm1996_vm1, %v1995_v20  ;;  %v1503_v20 = vld [vmem:[%s2277_s3 + $0x18] sm:$0xff]  ;;  %s2010_s3 = smov [#allocation6]  }
 0xa06   :  { %v1864_v32 = vpack.c.bf16 %v1503_v20, %v1502_v30  ;;  %s1620_s1 = sshll.u32 %s2010_s3, 4  ;;  %s1621_s1 = int_to_ptr.vmem [resolvable:$true] %s1620_s1 }
 0xa07   :  { %s1942_s13 = scalar_lea.vmem %s1621_s1, 1024  ;;  %p1947_p9 = scmp.lt.s32.totalorder %s1621_s1, %s1621_s1 }
 0xa08   :  { %1823 = vmatmul.mubr.msk.f32.vlgmr.msra.gmra.mrb[22].mxu1 %vm144_vm2, %v1408_v14  ;;  %1865 = vmatprep.subr.bf16.mxu0 %v1864_v32  ;;  %p1943_p8 = scmp.ne.s32.totalorder %s1621_s1, %s1942_s13  ;;  %p1948_p10 = scmp.lt.s32.totalorder %s1942_s13, %s1942_s13 }
 0xa09   :  { %1867 = vmatpush3.bf16.msra.mxu0 %v1864_v32 }
 0xa0a   :  { %p1949_p11 = por %p1948_p10, %p1947_p9 }
 0xa0c   :  { %p1950_p12 = pnand %p1949_p11, %p1943_p8 }
 0xacb   :  { %v801_v31 = vpop.f32.mrb[14].mxu1 }
 0xacc   :  { %814 = vrot.lane.b32.xlu1 %v801_v31, %s2009_s12  ;;  %v1784_v33 = vpop.f32.mrb[15].mxu1 }
 0xacf   :  { %v983_v34 = vpop.f32.mrb[16].mxu1 }
 0xad0   :  { %v1794_v35 = vpop.f32.mrb[17].mxu1 }
 0xad3   :  { %v1149_v36 = vpop.f32.mrb[18].mxu1 }
 0xad4   :  { %1486 = vrot.lane.b32.xlu0 %v1149_v36, %s1994_s8  ;;  %v1804_v37 = vpop.f32.mrb[19].mxu1 }
 0xad7   :  { %v1315_v38 = vpop.f32.mrb[20].mxu1 }
 0xad8   :  { %1490 = vrot.lane.b32.xlu0 %v1315_v38, %s2008_s25  ;;  %v1814_v39 = vpop.f32.mrb[21].mxu1 }
 0xadb   :  { %v1481_v40 = vpop.f32.mrb[22].mxu1 }
 0xadc   :  { %1494 = vrot.lane.b32.xlu1 %v1481_v40, %s2009_s12  ;;  %v1824_v41 = vpop.f32.mrb[23].mxu1 }
 0xb3e   :  { %v815_v47 = vpop.permute.xlu1 %814 }
 0xb3f   :  { %v821_v48 = vsel %vm820_vm4, %v819_v46, %v815_v47 }
 0xb40   :  { %1833 = vmatprep.mubr.msk.f32.mxu0 %vm1511_vm5, %v821_v48 }
 0xb46   :  { %v1487_v49 = vpop.permute.xlu0 %1486 }
 0xb47   :  { %v1497_v51 = vsel %vm144_vm2, %v983_v34, %v1487_v49 }
 0xb4a   :  { %v1491_v50 = vpop.permute.xlu0 %1490 }
 0xb4b   :  { %v1498_v52 = vsel %vm818_vm3, %v1497_v51, %v1491_v50 }
 0xb4e   :  { %v1495_v53 = vpop.permute.xlu1 %1494 }
 0xb4f   :  { %v1499_v54 = vsel %vm820_vm4, %v1498_v52, %v1495_v53 }
 0xb50   :  { %1834 = vmatmul.mubr.msk.f32.vlgmr.msra.gmra.mrb[10].mxu0 %vm1511_vm5, %v1499_v54 }
 0xb51   :  { %1953 = shalt.err (!%p1950_p12)
}
 0xb52   :  { %s1954_s0 = scalar_lea.hbm %s2280_s6, 1024 }
 0xb53   :  { %p1955_p13 = scmp.ne.s32.totalorder %s2280_s6, %s1954_s0  ;;  %p1958_p0 = scmp.lt.u32.totalorder %s1954_s0, %s2280_s6 }
 0xb55   :  { %p1960_p1 = pnand %p1958_p0, %p1955_p13 }
 0xb57   :  { %1963 = shalt.err (!%p1960_p1)
}
 0xb58   :  { %1626 = dma.vmem_to_hbm [thread:$0]  %s1621_s1, 1024, %s2280_s6, [#allocation7], %s1993_s7, %s1993_s7, %s1994_s8  }
 0xb59   :  { %v1663_v43 = vld [vmem:[%s2278_s4] ss:$0 sm:$0xff]  ;;  %s2011_s23 = smov [#allocation5]  }
 0xb5a   :  { %s1608_s24 = sshll.u32 %s2011_s23, 4  ;;  %s1609_s24 = int_to_ptr.vmem [resolvable:$true] %s1608_s24 }
 0xb5b   :  { %s1964_s25 = scalar_lea.vmem %s1609_s24, 256  ;;  %p1969_p3 = scmp.lt.s32.totalorder %s1609_s24, %s1609_s24 }
 0xb5c   :  { %p1965_p2 = scmp.ne.s32.totalorder %s1609_s24, %s1964_s25  ;;  %p1970_p4 = scmp.lt.s32.totalorder %s1964_s25, %s1964_s25 }
 0xb5e   :  { %p1971_p5 = por %p1970_p4, %p1969_p3 }
 0xb60   :  { %p1972_p6 = pnand %p1971_p5, %p1965_p2 }
 0xc23   :  { %v1835_v55 = vpop.f32.mrb[10].mxu0 }
 0xc24   :  { %v1590_v56 = vadd.f32 %v1835_v55, %v1663_v43  ;;  %v1584_v57 = vpop.f32.mrb[11].mxu0 }
 0xc25   :  { %v1585_v58 = vadd.f32 %v1663_v43, %v1584_v57 }
 0xc26   :  { %1594 = vst.msk [vmem:[#allocation5 + $0x8] sm:$0xff] %vm1511_vm5, %v1590_v56 }
 0xc27   :  { %1593 = vst.msk [vmem:[#allocation5] sm:$0xff] %vm1511_vm5, %v1585_v58 }
 0xc28   :  { %1975 = shalt.err (!%p1972_p6)
}
 0xc29   :  { %s1976_s26 = scalar_lea.hbm %s2279_s5, 256 }
 0xc2a   :  { %p1977_p7 = scmp.ne.s32.totalorder %s2279_s5, %s1976_s26  ;;  %p1980_p8 = scmp.lt.u32.totalorder %s1976_s26, %s2279_s5 }
 0xc2c   :  { %p1982_p9 = pnand %p1980_p8, %p1977_p7 }
 0xc2e   :  { %1985 = shalt.err (!%p1982_p9)
}
 0xc2f   :  { %1614 = dma.vmem_to_hbm [thread:$0]  %s1609_s24, 256, %s2279_s5, [#allocation4], %s1993_s7, %s1993_s7, %s1994_s8  }
 0xc30   :  { %1988 = dma.done.wait [#allocation4], 256  }
 0xc31   :  { %1989 = vsyncadd [#allocation4], 4294967040 }
 0xc32   :  { %1990 = dma.done.wait [#allocation7], 1024  }
 0xc33   :  { %1991 = vsyncadd [#allocation7], 4294966272 }
 0xc34   :  { %1633 = vsyncpa [#allocation3], 1 }
 0xc35   :  { %1634 = vsyncpa [#allocation4], 1 }
 0xc36   :  { %1635 = vsyncpa [#allocation7], 1 }

</bundles_post_ra>
